<compile_context>
chip_gen: v7x
topology: tpu7x:2x2x1
jax: 0.10.0
libtpu: 0.0.40
codegen_flags: <defaults>
</compile_context>

<pallas_src>
import functools

import jax
import jax.numpy as jnp
import numpy as np
from jax.experimental import pallas as pl
from jax.experimental.pallas import tpu as pltpu


def _round_up(x, m):
    return (x + m - 1) // m * m


def up_kernel(x_ref, skip_ref, mask_ref, wcat_ref, w2_ref, aff_ref, out_ref,
              *, offsets, hw_valid, eps):
    """Processes NB batch samples per grid step in lane-dense (C, L) layout.

    x_ref    : (NB, C2, XL)      zero-padded conv-transpose input, flattened,
                                 lane-padded so every shifted slice is in-bounds
    skip_ref : (NB, C2, L)       skip connection embedded on the wide (Ho, Wp)
                                 grid, lane-padded to a multiple of 128
    mask_ref : (1, L)            1.0 on valid (Ho, Wo) positions, 0.0 on junk /
                                 padding columns of the wide grid
    wcat_ref : (K*K+1, Cmid, C2) folded weights:
                 [0]    = w1[:, :C2]                  (skip half of the concat)
                 [1+kk] = w1[:, C2:] @ wt_flip[kk].T  (conv-transpose folded
                                                        into the first 1x1 conv)
    w2_ref   : (Cout, Cmid)      second 1x1 conv weight
    aff_ref  : (Cout, 5)         columns [b_fold, g1, b1, g2, b2]
    out_ref  : (NB, Cout, L)
    """
    nb = x_ref.shape[0]
    cmid = wcat_ref.shape[1]
    cout = w2_ref.shape[0]
    L = skip_ref.shape[2]

    mask = mask_ref[...]                       # (1, L), broadcast over sublanes
    b_fold = aff_ref[:, 0:1]                   # (Cmid, 1), broadcast over lanes
    g1, b1 = aff_ref[:, 1:2], aff_ref[:, 2:3]
    g2, b2 = aff_ref[:, 3:4], aff_ref[:, 4:5]

    inv_n1 = 1.0 / (cmid * hw_valid)
    inv_n2 = 1.0 / (cout * hw_valid)

    def gn_silu(v, gamma, beta, inv_n):
        # GroupNorm(num_groups=1): stats over channels x valid spatial positions.
        vm = v * mask
        s1 = jnp.sum(vm)                       # sum of valid values
        s2 = jnp.sum(v * vm)                   # sum of squared valid values
        mu = s1 * inv_n
        var = s2 * inv_n - mu * mu
        scale = gamma * jax.lax.rsqrt(var + eps)      # (C, 1)
        shift = beta - mu * scale                     # (C, 1)
        vn = v * scale + shift                        # single FMA pass
        return vn * jax.nn.sigmoid(vn)                # SiLU (sigmoid -> EUP)

    for b in range(nb):                        # static, small
        # ConvTranspose2d + concat + first 1x1 conv, fully folded into
        # K*K+1 accumulating matmuls over lane-dense (C, L) tiles.
        h = jnp.dot(wcat_ref[0], skip_ref[b], preferred_element_type=jnp.float32)
        for kk, s in enumerate(offsets):       # static flat lane-slices
            h = h + jnp.dot(wcat_ref[kk + 1], x_ref[b, :, s:s + L],
                            preferred_element_type=jnp.float32)
        h = h + b_fold

        h = gn_silu(h, g1, b1, inv_n1)
        h = jnp.dot(w2_ref[...], h, preferred_element_type=jnp.float32)
        h = gn_silu(h, g2, b2, inv_n2)
        out_ref[b] = h.astype(out_ref.dtype)


def _pick_batch_block(n, cap=8):
    """Largest divisor of n that is <= cap (samples per grid step)."""
    nb = min(n, cap)
    while n % nb:
        nb -= 1
    return nb


@functools.partial(jax.jit, static_argnames=("kernel_size",))
def up_forward(x_nchw, skip_nchw, params, *, kernel_size):
    """x_nchw: (N, in_nch//2, H, W), skip_nchw: (N, in_nch//2, H+K-1, W+K-1)."""
    K = kernel_size
    wt, wt_bias, w1, g1, b1, w2, g2, b2 = params

    N, C2, H, W = x_nchw.shape
    Ho, Wo = H + K - 1, W + K - 1               # conv-transpose output grid
    Hp, Wp = H + 2 * (K - 1), W + 2 * (K - 1)   # zero-padded input grid
    L = Ho * Wp - (K - 1)                       # "wide" flat output length
    Lp = _round_up(L, 128)                      # lane-dense (unmasked stores)
    max_off = (K - 1) * (Wp + 1)                # largest flat shift
    XL = _round_up(max_off + Lp, 128)           # flat input length (in-bounds)
    Cmid = w1.shape[0]                          # out_nch
    Cout = w2.shape[0]                          # out_nch
    assert Cmid == Cout                         # module guarantees this
    f32 = jnp.float32

    # ---- fold ConvTranspose (flipped) + concat + first 1x1 conv weights ----
    w1_skip = w1[:, :C2].astype(f32)            # (Cmid, C2)   skip half of cat
    w1_ct = w1[:, C2:].astype(f32)              # (Cmid, C2)   conv-trans half
    wfold = [w1_skip]
    offsets = []
    for kh in range(K):
        for kw in range(K):
            wflip = wt[:, :, K - 1 - kh, K - 1 - kw].astype(f32)  # (ci, co)
            wfold.append(w1_ct @ wflip.T)       # (Cmid, C2), indexed by ci
            offsets.append(kh * Wp + kw)        # flat shift on the wide grid
    wcat = jnp.stack(wfold, axis=0)             # (K*K+1, Cmid, C2)
    b_fold = w1_ct @ wt_bias.astype(f32)        # (Cmid,)
    aff = jnp.stack([b_fold, g1, b1, g2, b2], axis=1).astype(f32)  # (Cout, 5)

    # ---- glue: pad once, flatten; NO K*K shifted copies in HBM ----
    x_pad = jnp.pad(x_nchw.astype(f32),
                    ((0, 0), (0, 0), (K - 1, K - 1), (K - 1, K - 1)))
    x_flat = x_pad.reshape(N, C2, Hp * Wp)
    x_flat = jnp.pad(x_flat, ((0, 0), (0, 0), (0, XL - Hp * Wp)))

    skip_wide = jnp.pad(skip_nchw.astype(f32),
                        ((0, 0), (0, 0), (0, 0), (0, K - 1)))      # (N,C2,Ho,Wp)
    skip_wide = skip_wide.reshape(N, C2, Ho * Wp)[:, :, :L]
    skip_wide = jnp.pad(skip_wide, ((0, 0), (0, 0), (0, Lp - L)))

    idx = jnp.arange(Lp, dtype=jnp.int32)
    mask = ((idx < L) & ((idx % Wp) < Wo)).astype(f32).reshape(1, Lp)

    NB = _pick_batch_block(N)
    grid = (N // NB,)
    KK1 = K * K + 1

    kern = functools.partial(up_kernel, offsets=tuple(offsets),
                             hw_valid=Ho * Wo, eps=1e-5)

    out_wide = pl.pallas_call(
        kern,
        out_shape=jax.ShapeDtypeStruct((N, Cout, Lp), f32),
        grid_spec=pltpu.PrefetchScalarGridSpec(
            num_scalar_prefetch=0,
            grid=grid,
            in_specs=[
                pl.BlockSpec((NB, C2, XL), lambda g: (g, 0, 0)),
                pl.BlockSpec((NB, C2, Lp), lambda g: (g, 0, 0)),
                pl.BlockSpec((1, Lp), lambda g: (0, 0)),
                pl.BlockSpec((KK1, Cmid, C2), lambda g: (0, 0, 0)),
                pl.BlockSpec((Cout, Cmid), lambda g: (0, 0)),
                pl.BlockSpec((Cout, 5), lambda g: (0, 0)),
            ],
            out_specs=pl.BlockSpec((NB, Cout, Lp), lambda g: (g, 0, 0)),
        ),
        compiler_params=pltpu.CompilerParams(
            dimension_semantics=("parallel",)),
    )(x_flat, skip_wide, mask, wcat, w2.astype(f32), aff)

    # strip lane padding + the K-1 junk columns of the wide grid -> NCHW output
    out_full = jnp.pad(out_wide[:, :, :L], ((0, 0), (0, 0), (0, K - 1)))
    out = out_full.reshape(N, Cout, Ho, Wp)[:, :, :, :Wo]
    return out


def ref_up(x, skip, params, K):
    """Pure-JAX reference with PyTorch (NCHW) semantics, different formulation."""
    wt, wt_bias, w1, g1, b1, w2, g2, b2 = params
    N, C2, H, W = x.shape
    Ho, Wo = H + K - 1, W + K - 1
    out = jnp.zeros((N, C2, Ho, Wo), jnp.float32)
    for kh in range(K):
        for kw in range(K):
            out = out.at[:, :, kh:kh + H, kw:kw + W].add(
                jnp.einsum('ncij,cd->ndij', x, wt[:, :, kh, kw]))
    out = out + wt_bias[None, :, None, None]
    h = jnp.concatenate([skip, out], axis=1)

    def block(h, w, g, b):
        h = jnp.einsum('nchw,dc->ndhw', h, w)            # 1x1 conv, no bias
        mu = jnp.mean(h, axis=(1, 2, 3), keepdims=True)
        var = jnp.mean((h - mu) ** 2, axis=(1, 2, 3), keepdims=True)
        hn = (h - mu) / jnp.sqrt(var + 1e-5)
        hn = hn * g[None, :, None, None] + b[None, :, None, None]
        return hn * jax.nn.sigmoid(hn)

    h = block(h, w1, g1, b1)
    h = block(h, w2, g2, b2)
    return h


if __name__ == "__main__":
    # Small shapes: Up(in_nch=8, out_nch=8, kernel_size=2)
    N, in_nch, out_nch, K = 2, 8, 8, 2
    C2 = in_nch // 2
    H = W = 15
    Ho, Wo = H + K - 1, W + K - 1

    key = jax.random.PRNGKey(0)
    ks = jax.random.split(key, 10)

    # Deterministic synthetic parameters (PyTorch weight-shape conventions).
    wt = 0.2 * jax.random.normal(ks[0], (C2, C2, K, K), jnp.float32)   # ConvTranspose2d
    wt_bias = 0.1 * jax.random.normal(ks[1], (C2,), jnp.float32)
    w1 = 0.2 * jax.random.normal(ks[2], (out_nch, in_nch), jnp.float32)  # 1x1 conv (out,in)
    g1 = 1.0 + 0.1 * jax.random.normal(ks[3], (out_nch,), jnp.float32)
    b1 = 0.1 * jax.random.normal(ks[4], (out_nch,), jnp.float32)
    w2 = 0.2 * jax.random.normal(ks[5], (out_nch, out_nch), jnp.float32)
    g2 = 1.0 + 0.1 * jax.random.normal(ks[6], (out_nch,), jnp.float32)
    b2 = 0.1 * jax.random.normal(ks[7], (out_nch,), jnp.float32)
    params = (wt, wt_bias, w1, g1, b1, w2, g2, b2)

    # Inputs (PyTorch NCHW convention).
    x = jax.random.normal(ks[8], (N, C2, H, W), jnp.float32)
    skip_x = jax.random.normal(ks[9], (N, C2, Ho, Wo), jnp.float32)

    out = up_forward(x, skip_x, params, kernel_size=K)
    out = jax.block_until_ready(out)

    assert out.shape == (N, out_nch, Ho, Wo), out.shape

    ref = ref_up(x, skip_x, params, K)
    np.testing.assert_allclose(np.asarray(out), np.asarray(ref),
                               rtol=2e-3, atol=2e-3)

    print("KERNEL_OK")
</pallas_src>

<mosaic_0001>
module attributes {stable_mosaic.version = 11 : i64} {
  func.func @up_kernel(%arg0: i32, %arg1: memref<2x4x512xf32, #tpu.memory_space<vmem>>, %arg2: memref<2x4x384xf32, #tpu.memory_space<vmem>>, %arg3: memref<1x384xf32, #tpu.memory_space<vmem>>, %arg4: memref<5x8x4xf32, #tpu.memory_space<vmem>>, %arg5: memref<8x8xf32, #tpu.memory_space<vmem>>, %arg6: memref<8x5xf32, #tpu.memory_space<vmem>>, %arg7: memref<2x8x384xf32, #tpu.memory_space<vmem>>) attributes {dimension_semantics = [#tpu.dimension_semantics<parallel>], iteration_bounds = array<i64: 1>, scalar_prefetch = 0 : i64, scratch_operands = 0 : i64, tpu.core_type = #tpu.core_type<tc>, window_params = [{transform_indices = @transform_0, window_bounds = array<i64: 2, 4, 512>}, {transform_indices = @transform_1, window_bounds = array<i64: 2, 4, 384>}, {pipeline_mode = #tpu.pipeline_mode<synchronous>, transform_indices = @transform_2, window_bounds = array<i64: 1, 384>}, {pipeline_mode = #tpu.pipeline_mode<synchronous>, transform_indices = @transform_3, window_bounds = array<i64: 5, 8, 4>}, {pipeline_mode = #tpu.pipeline_mode<synchronous>, transform_indices = @transform_4, window_bounds = array<i64: 8, 8>}, {pipeline_mode = #tpu.pipeline_mode<synchronous>, transform_indices = @transform_5, window_bounds = array<i64: 8, 5>}, {transform_indices = @transform_6, window_bounds = array<i64: 2, 8, 384>}]} {
    %c0 = arith.constant 0 : index
    %c0_0 = arith.constant 0 : index
    %0 = vector.load %arg3[%c0, %c0_0] : memref<1x384xf32, #tpu.memory_space<vmem>>, vector<1x384xf32>
    %c0_1 = arith.constant 0 : index
    %c0_2 = arith.constant 0 : index
    %1 = vector.load %arg6[%c0_1, %c0_2] : memref<8x5xf32, #tpu.memory_space<vmem>>, vector<8x1xf32>
    %c0_3 = arith.constant 0 : index
    %c1 = arith.constant 1 : index
    %2 = vector.load %arg6[%c0_3, %c1] : memref<8x5xf32, #tpu.memory_space<vmem>>, vector<8x1xf32>
    %c0_4 = arith.constant 0 : index
    %c2 = arith.constant 2 : index
    %3 = vector.load %arg6[%c0_4, %c2] : memref<8x5xf32, #tpu.memory_space<vmem>>, vector<8x1xf32>
    %c0_5 = arith.constant 0 : index
    %c3 = arith.constant 3 : index
    %4 = vector.load %arg6[%c0_5, %c3] : memref<8x5xf32, #tpu.memory_space<vmem>>, vector<8x1xf32>
    %c0_6 = arith.constant 0 : index
    %c4 = arith.constant 4 : index
    %5 = vector.load %arg6[%c0_6, %c4] : memref<8x5xf32, #tpu.memory_space<vmem>>, vector<8x1xf32>
    %c0_7 = arith.constant 0 : index
    %c0_8 = arith.constant 0 : index
    %c0_9 = arith.constant 0 : index
    %6 = vector.load %arg4[%c0_7, %c0_8, %c0_9] : memref<5x8x4xf32, #tpu.memory_space<vmem>>, vector<1x8x4xf32>
    %7 = vector.shape_cast %6 : vector<1x8x4xf32> to vector<8x4xf32>
    %c0_10 = arith.constant 0 : index
    %c0_11 = arith.constant 0 : index
    %c0_12 = arith.constant 0 : index
    %8 = vector.load %arg2[%c0_10, %c0_11, %c0_12] : memref<2x4x384xf32, #tpu.memory_space<vmem>>, vector<1x4x384xf32>
    %9 = vector.shape_cast %8 : vector<1x4x384xf32> to vector<4x384xf32>
    %cst = arith.constant dense<0.000000e+00> : vector<8x384xf32>
    %10 = tpu.matmul %7, %9, %cst {dimension_numbers = #tpu.dot_dimension_numbers<[1], [0], [0], [1], [0, 0, 1, 1], [], []>} : vector<8x4xf32>, vector<4x384xf32>, vector<8x384xf32> -> vector<8x384xf32>
    %c1_13 = arith.constant 1 : index
    %c0_14 = arith.constant 0 : index
    %c0_15 = arith.constant 0 : index
    %11 = vector.load %arg4[%c1_13, %c0_14, %c0_15] : memref<5x8x4xf32, #tpu.memory_space<vmem>>, vector<1x8x4xf32>
    %12 = vector.shape_cast %11 : vector<1x8x4xf32> to vector<8x4xf32>
    %c0_16 = arith.constant 0 : index
    %c0_17 = arith.constant 0 : index
    %c0_18 = arith.constant 0 : index
    %13 = vector.load %arg1[%c0_16, %c0_17, %c0_18] : memref<2x4x512xf32, #tpu.memory_space<vmem>>, vector<1x4x384xf32>
    %14 = vector.shape_cast %13 : vector<1x4x384xf32> to vector<4x384xf32>
    %cst_19 = arith.constant dense<0.000000e+00> : vector<8x384xf32>
    %15 = tpu.matmul %12, %14, %cst_19 {dimension_numbers = #tpu.dot_dimension_numbers<[1], [0], [0], [1], [0, 0, 1, 1], [], []>} : vector<8x4xf32>, vector<4x384xf32>, vector<8x384xf32> -> vector<8x384xf32>
    %16 = arith.addf %10, %15 : vector<8x384xf32>
    %c2_20 = arith.constant 2 : index
    %c0_21 = arith.constant 0 : index
    %c0_22 = arith.constant 0 : index
    %17 = vector.load %arg4[%c2_20, %c0_21, %c0_22] : memref<5x8x4xf32, #tpu.memory_space<vmem>>, vector<1x8x4xf32>
    %18 = vector.shape_cast %17 : vector<1x8x4xf32> to vector<8x4xf32>
    %c0_23 = arith.constant 0 : index
    %c0_24 = arith.constant 0 : index
    %c1_25 = arith.constant 1 : index
    %19 = vector.load %arg1[%c0_23, %c0_24, %c1_25] : memref<2x4x512xf32, #tpu.memory_space<vmem>>, vector<1x4x384xf32>
    %20 = vector.shape_cast %19 : vector<1x4x384xf32> to vector<4x384xf32>
    %cst_26 = arith.constant dense<0.000000e+00> : vector<8x384xf32>
    %21 = tpu.matmul %18, %20, %cst_26 {dimension_numbers = #tpu.dot_dimension_numbers<[1], [0], [0], [1], [0, 0, 1, 1], [], []>} : vector<8x4xf32>, vector<4x384xf32>, vector<8x384xf32> -> vector<8x384xf32>
    %22 = arith.addf %16, %21 : vector<8x384xf32>
    %c3_27 = arith.constant 3 : index
    %c0_28 = arith.constant 0 : index
    %c0_29 = arith.constant 0 : index
    %23 = vector.load %arg4[%c3_27, %c0_28, %c0_29] : memref<5x8x4xf32, #tpu.memory_space<vmem>>, vector<1x8x4xf32>
    %24 = vector.shape_cast %23 : vector<1x8x4xf32> to vector<8x4xf32>
    %c0_30 = arith.constant 0 : index
    %c0_31 = arith.constant 0 : index
    %c17 = arith.constant 17 : index
    %25 = vector.load %arg1[%c0_30, %c0_31, %c17] : memref<2x4x512xf32, #tpu.memory_space<vmem>>, vector<1x4x384xf32>
    %26 = vector.shape_cast %25 : vector<1x4x384xf32> to vector<4x384xf32>
    %cst_32 = arith.constant dense<0.000000e+00> : vector<8x384xf32>
    %27 = tpu.matmul %24, %26, %cst_32 {dimension_numbers = #tpu.dot_dimension_numbers<[1], [0], [0], [1], [0, 0, 1, 1], [], []>} : vector<8x4xf32>, vector<4x384xf32>, vector<8x384xf32> -> vector<8x384xf32>
    %28 = arith.addf %22, %27 : vector<8x384xf32>
    %c4_33 = arith.constant 4 : index
    %c0_34 = arith.constant 0 : index
    %c0_35 = arith.constant 0 : index
    %29 = vector.load %arg4[%c4_33, %c0_34, %c0_35] : memref<5x8x4xf32, #tpu.memory_space<vmem>>, vector<1x8x4xf32>
    %30 = vector.shape_cast %29 : vector<1x8x4xf32> to vector<8x4xf32>
    %c0_36 = arith.constant 0 : index
    %c0_37 = arith.constant 0 : index
    %c18 = arith.constant 18 : index
    %31 = vector.load %arg1[%c0_36, %c0_37, %c18] : memref<2x4x512xf32, #tpu.memory_space<vmem>>, vector<1x4x384xf32>
    %32 = vector.shape_cast %31 : vector<1x4x384xf32> to vector<4x384xf32>
    %cst_38 = arith.constant dense<0.000000e+00> : vector<8x384xf32>
    %33 = tpu.matmul %30, %32, %cst_38 {dimension_numbers = #tpu.dot_dimension_numbers<[1], [0], [0], [1], [0, 0, 1, 1], [], []>} : vector<8x4xf32>, vector<4x384xf32>, vector<8x384xf32> -> vector<8x384xf32>
    %34 = arith.addf %28, %33 : vector<8x384xf32>
    %35 = vector.broadcast %1 : vector<8x1xf32> to vector<8x384xf32>
    %36 = arith.addf %34, %35 : vector<8x384xf32>
    %37 = vector.broadcast %0 : vector<1x384xf32> to vector<8x384xf32>
    %38 = arith.mulf %36, %37 : vector<8x384xf32>
    %39 = vector.shape_cast %38 : vector<8x384xf32> to vector<1x8x384xf32>
    %cst_39 = arith.constant dense<0.000000e+00> : vector<1xf32>
    %40 = vector.multi_reduction <add>, %39, %cst_39 [1, 2] : vector<1x8x384xf32> to vector<1xf32>
    %41 = vector.shape_cast %40 : vector<1xf32> to vector<1x1x1xf32>
    %42 = vector.extract %41[0, 0, 0] : f32 from vector<1x1x1xf32>
    %43 = arith.mulf %36, %38 : vector<8x384xf32>
    %44 = vector.shape_cast %43 : vector<8x384xf32> to vector<1x8x384xf32>
    %cst_40 = arith.constant dense<0.000000e+00> : vector<1xf32>
    %45 = vector.multi_reduction <add>, %44, %cst_40 [1, 2] : vector<1x8x384xf32> to vector<1xf32>
    %46 = vector.shape_cast %45 : vector<1xf32> to vector<1x1x1xf32>
    %47 = vector.extract %46[0, 0, 0] : f32 from vector<1x1x1xf32>
    %cst_41 = arith.constant 4.8828125E-4 : f32
    %48 = arith.mulf %42, %cst_41 : f32
    %cst_42 = arith.constant 4.8828125E-4 : f32
    %49 = arith.mulf %47, %cst_42 : f32
    %50 = arith.mulf %48, %48 : f32
    %51 = arith.subf %49, %50 : f32
    %cst_43 = arith.constant 9.99999974E-6 : f32
    %52 = arith.addf %51, %cst_43 : f32
    %53 = math.rsqrt %52 : f32
    %54 = vector.broadcast %53 : f32 to vector<8x1xf32>
    %55 = arith.mulf %2, %54 : vector<8x1xf32>
    %56 = vector.broadcast %48 : f32 to vector<8x1xf32>
    %57 = arith.mulf %56, %55 : vector<8x1xf32>
    %58 = arith.subf %3, %57 : vector<8x1xf32>
    %59 = vector.broadcast %55 : vector<8x1xf32> to vector<8x384xf32>
    %60 = arith.mulf %36, %59 : vector<8x384xf32>
    %61 = vector.broadcast %58 : vector<8x1xf32> to vector<8x384xf32>
    %62 = arith.addf %60, %61 : vector<8x384xf32>
    %63 = arith.negf %62 : vector<8x384xf32>
    %64 = math.exp %63 : vector<8x384xf32>
    %cst_44 = arith.constant 1.000000e+00 : f32
    %65 = vector.broadcast %cst_44 : f32 to vector<8x384xf32>
    %66 = arith.addf %65, %64 : vector<8x384xf32>
    %67 = arith.divf %65, %66 : vector<8x384xf32>
    %68 = arith.mulf %62, %67 : vector<8x384xf32>
    %c0_45 = arith.constant 0 : index
    %c0_46 = arith.constant 0 : index
    %69 = vector.load %arg5[%c0_45, %c0_46] : memref<8x8xf32, #tpu.memory_space<vmem>>, vector<8x8xf32>
    %cst_47 = arith.constant dense<0.000000e+00> : vector<8x384xf32>
    %70 = tpu.matmul %69, %68, %cst_47 {dimension_numbers = #tpu.dot_dimension_numbers<[1], [0], [0], [1], [0, 0, 1, 1], [], []>} : vector<8x8xf32>, vector<8x384xf32>, vector<8x384xf32> -> vector<8x384xf32>
    %71 = vector.broadcast %0 : vector<1x384xf32> to vector<8x384xf32>
    %72 = arith.mulf %70, %71 : vector<8x384xf32>
    %73 = vector.shape_cast %72 : vector<8x384xf32> to vector<1x8x384xf32>
    %cst_48 = arith.constant dense<0.000000e+00> : vector<1xf32>
    %74 = vector.multi_reduction <add>, %73, %cst_48 [1, 2] : vector<1x8x384xf32> to vector<1xf32>
    %75 = vector.shape_cast %74 : vector<1xf32> to vector<1x1x1xf32>
    %76 = vector.extract %75[0, 0, 0] : f32 from vector<1x1x1xf32>
    %77 = arith.mulf %70, %72 : vector<8x384xf32>
    %78 = vector.shape_cast %77 : vector<8x384xf32> to vector<1x8x384xf32>
    %cst_49 = arith.constant dense<0.000000e+00> : vector<1xf32>
    %79 = vector.multi_reduction <add>, %78, %cst_49 [1, 2] : vector<1x8x384xf32> to vector<1xf32>
    %80 = vector.shape_cast %79 : vector<1xf32> to vector<1x1x1xf32>
    %81 = vector.extract %80[0, 0, 0] : f32 from vector<1x1x1xf32>
    %cst_50 = arith.constant 4.8828125E-4 : f32
    %82 = arith.mulf %76, %cst_50 : f32
    %cst_51 = arith.constant 4.8828125E-4 : f32
    %83 = arith.mulf %81, %cst_51 : f32
    %84 = arith.mulf %82, %82 : f32
    %85 = arith.subf %83, %84 : f32
    %cst_52 = arith.constant 9.99999974E-6 : f32
    %86 = arith.addf %85, %cst_52 : f32
    %87 = math.rsqrt %86 : f32
    %88 = vector.broadcast %87 : f32 to vector<8x1xf32>
    %89 = arith.mulf %4, %88 : vector<8x1xf32>
    %90 = vector.broadcast %82 : f32 to vector<8x1xf32>
    %91 = arith.mulf %90, %89 : vector<8x1xf32>
    %92 = arith.subf %5, %91 : vector<8x1xf32>
    %93 = vector.broadcast %89 : vector<8x1xf32> to vector<8x384xf32>
    %94 = arith.mulf %70, %93 : vector<8x384xf32>
    %95 = vector.broadcast %92 : vector<8x1xf32> to vector<8x384xf32>
    %96 = arith.addf %94, %95 : vector<8x384xf32>
    %97 = arith.negf %96 : vector<8x384xf32>
    %98 = math.exp %97 : vector<8x384xf32>
    %cst_53 = arith.constant 1.000000e+00 : f32
    %99 = vector.broadcast %cst_53 : f32 to vector<8x384xf32>
    %100 = arith.addf %99, %98 : vector<8x384xf32>
    %101 = arith.divf %99, %100 : vector<8x384xf32>
    %102 = arith.mulf %96, %101 : vector<8x384xf32>
    %c0_54 = arith.constant 0 : index
    %c0_55 = arith.constant 0 : index
    %c0_56 = arith.constant 0 : index
    %103 = vector.load %arg7[%c0_54, %c0_55, %c0_56] : memref<2x8x384xf32, #tpu.memory_space<vmem>>, vector<1x8x384xf32>
    %104 = vector.shape_cast %103 : vector<1x8x384xf32> to vector<8x384xf32>
    %105 = vector.shape_cast %102 : vector<8x384xf32> to vector<1x8x384xf32>
    tpu.vector_store %arg7[%c0_54, %c0_55, %c0_56], %105 {strides = array<i32>} : memref<2x8x384xf32, #tpu.memory_space<vmem>>, vector<1x8x384xf32>,
    %c0_57 = arith.constant 0 : index
    %c0_58 = arith.constant 0 : index
    %c0_59 = arith.constant 0 : index
    %106 = vector.load %arg4[%c0_57, %c0_58, %c0_59] : memref<5x8x4xf32, #tpu.memory_space<vmem>>, vector<1x8x4xf32>
    %107 = vector.shape_cast %106 : vector<1x8x4xf32> to vector<8x4xf32>
    %c1_60 = arith.constant 1 : index
    %c0_61 = arith.constant 0 : index
    %c0_62 = arith.constant 0 : index
    %108 = vector.load %arg2[%c1_60, %c0_61, %c0_62] : memref<2x4x384xf32, #tpu.memory_space<vmem>>, vector<1x4x384xf32>
    %109 = vector.shape_cast %108 : vector<1x4x384xf32> to vector<4x384xf32>
    %cst_63 = arith.constant dense<0.000000e+00> : vector<8x384xf32>
    %110 = tpu.matmul %107, %109, %cst_63 {dimension_numbers = #tpu.dot_dimension_numbers<[1], [0], [0], [1], [0, 0, 1, 1], [], []>} : vector<8x4xf32>, vector<4x384xf32>, vector<8x384xf32> -> vector<8x384xf32>
    %c1_64 = arith.constant 1 : index
    %c0_65 = arith.constant 0 : index
    %c0_66 = arith.constant 0 : index
    %111 = vector.load %arg4[%c1_64, %c0_65, %c0_66] : memref<5x8x4xf32, #tpu.memory_space<vmem>>, vector<1x8x4xf32>
    %112 = vector.shape_cast %111 : vector<1x8x4xf32> to vector<8x4xf32>
    %c1_67 = arith.constant 1 : index
    %c0_68 = arith.constant 0 : index
    %c0_69 = arith.constant 0 : index
    %113 = vector.load %arg1[%c1_67, %c0_68, %c0_69] : memref<2x4x512xf32, #tpu.memory_space<vmem>>, vector<1x4x384xf32>
    %114 = vector.shape_cast %113 : vector<1x4x384xf32> to vector<4x384xf32>
    %cst_70 = arith.constant dense<0.000000e+00> : vector<8x384xf32>
    %115 = tpu.matmul %112, %114, %cst_70 {dimension_numbers = #tpu.dot_dimension_numbers<[1], [0], [0], [1], [0, 0, 1, 1], [], []>} : vector<8x4xf32>, vector<4x384xf32>, vector<8x384xf32> -> vector<8x384xf32>
    %116 = arith.addf %110, %115 : vector<8x384xf32>
    %c2_71 = arith.constant 2 : index
    %c0_72 = arith.constant 0 : index
    %c0_73 = arith.constant 0 : index
    %117 = vector.load %arg4[%c2_71, %c0_72, %c0_73] : memref<5x8x4xf32, #tpu.memory_space<vmem>>, vector<1x8x4xf32>
    %118 = vector.shape_cast %117 : vector<1x8x4xf32> to vector<8x4xf32>
    %c1_74 = arith.constant 1 : index
    %c0_75 = arith.constant 0 : index
    %c1_76 = arith.constant 1 : index
    %119 = vector.load %arg1[%c1_74, %c0_75, %c1_76] : memref<2x4x512xf32, #tpu.memory_space<vmem>>, vector<1x4x384xf32>
    %120 = vector.shape_cast %119 : vector<1x4x384xf32> to vector<4x384xf32>
    %cst_77 = arith.constant dense<0.000000e+00> : vector<8x384xf32>
    %121 = tpu.matmul %118, %120, %cst_77 {dimension_numbers = #tpu.dot_dimension_numbers<[1], [0], [0], [1], [0, 0, 1, 1], [], []>} : vector<8x4xf32>, vector<4x384xf32>, vector<8x384xf32> -> vector<8x384xf32>
    %122 = arith.addf %116, %121 : vector<8x384xf32>
    %c3_78 = arith.constant 3 : index
    %c0_79 = arith.constant 0 : index
    %c0_80 = arith.constant 0 : index
    %123 = vector.load %arg4[%c3_78, %c0_79, %c0_80] : memref<5x8x4xf32, #tpu.memory_space<vmem>>, vector<1x8x4xf32>
    %124 = vector.shape_cast %123 : vector<1x8x4xf32> to vector<8x4xf32>
    %c1_81 = arith.constant 1 : index
    %c0_82 = arith.constant 0 : index
    %c17_83 = arith.constant 17 : index
    %125 = vector.load %arg1[%c1_81, %c0_82, %c17_83] : memref<2x4x512xf32, #tpu.memory_space<vmem>>, vector<1x4x384xf32>
    %126 = vector.shape_cast %125 : vector<1x4x384xf32> to vector<4x384xf32>
    %cst_84 = arith.constant dense<0.000000e+00> : vector<8x384xf32>
    %127 = tpu.matmul %124, %126, %cst_84 {dimension_numbers = #tpu.dot_dimension_numbers<[1], [0], [0], [1], [0, 0, 1, 1], [], []>} : vector<8x4xf32>, vector<4x384xf32>, vector<8x384xf32> -> vector<8x384xf32>
    %128 = arith.addf %122, %127 : vector<8x384xf32>
    %c4_85 = arith.constant 4 : index
    %c0_86 = arith.constant 0 : index
    %c0_87 = arith.constant 0 : index
    %129 = vector.load %arg4[%c4_85, %c0_86, %c0_87] : memref<5x8x4xf32, #tpu.memory_space<vmem>>, vector<1x8x4xf32>
    %130 = vector.shape_cast %129 : vector<1x8x4xf32> to vector<8x4xf32>
    %c1_88 = arith.constant 1 : index
    %c0_89 = arith.constant 0 : index
    %c18_90 = arith.constant 18 : index
    %131 = vector.load %arg1[%c1_88, %c0_89, %c18_90] : memref<2x4x512xf32, #tpu.memory_space<vmem>>, vector<1x4x384xf32>
    %132 = vector.shape_cast %131 : vector<1x4x384xf32> to vector<4x384xf32>
    %cst_91 = arith.constant dense<0.000000e+00> : vector<8x384xf32>
    %133 = tpu.matmul %130, %132, %cst_91 {dimension_numbers = #tpu.dot_dimension_numbers<[1], [0], [0], [1], [0, 0, 1, 1], [], []>} : vector<8x4xf32>, vector<4x384xf32>, vector<8x384xf32> -> vector<8x384xf32>
    %134 = arith.addf %128, %133 : vector<8x384xf32>
    %135 = vector.broadcast %1 : vector<8x1xf32> to vector<8x384xf32>
    %136 = arith.addf %134, %135 : vector<8x384xf32>
    %137 = vector.broadcast %0 : vector<1x384xf32> to vector<8x384xf32>
    %138 = arith.mulf %136, %137 : vector<8x384xf32>
    %139 = vector.shape_cast %138 : vector<8x384xf32> to vector<1x8x384xf32>
    %cst_92 = arith.constant dense<0.000000e+00> : vector<1xf32>
    %140 = vector.multi_reduction <add>, %139, %cst_92 [1, 2] : vector<1x8x384xf32> to vector<1xf32>
    %141 = vector.shape_cast %140 : vector<1xf32> to vector<1x1x1xf32>
    %142 = vector.extract %141[0, 0, 0] : f32 from vector<1x1x1xf32>
    %143 = arith.mulf %136, %138 : vector<8x384xf32>
    %144 = vector.shape_cast %143 : vector<8x384xf32> to vector<1x8x384xf32>
    %cst_93 = arith.constant dense<0.000000e+00> : vector<1xf32>
    %145 = vector.multi_reduction <add>, %144, %cst_93 [1, 2] : vector<1x8x384xf32> to vector<1xf32>
    %146 = vector.shape_cast %145 : vector<1xf32> to vector<1x1x1xf32>
    %147 = vector.extract %146[0, 0, 0] : f32 from vector<1x1x1xf32>
    %cst_94 = arith.constant 4.8828125E-4 : f32
    %148 = arith.mulf %142, %cst_94 : f32
    %cst_95 = arith.constant 4.8828125E-4 : f32
    %149 = arith.mulf %147, %cst_95 : f32
    %150 = arith.mulf %148, %148 : f32
    %151 = arith.subf %149, %150 : f32
    %cst_96 = arith.constant 9.99999974E-6 : f32
    %152 = arith.addf %151, %cst_96 : f32
    %153 = math.rsqrt %152 : f32
    %154 = vector.broadcast %153 : f32 to vector<8x1xf32>
    %155 = arith.mulf %2, %154 : vector<8x1xf32>
    %156 = vector.broadcast %148 : f32 to vector<8x1xf32>
    %157 = arith.mulf %156, %155 : vector<8x1xf32>
    %158 = arith.subf %3, %157 : vector<8x1xf32>
    %159 = vector.broadcast %155 : vector<8x1xf32> to vector<8x384xf32>
    %160 = arith.mulf %136, %159 : vector<8x384xf32>
    %161 = vector.broadcast %158 : vector<8x1xf32> to vector<8x384xf32>
    %162 = arith.addf %160, %161 : vector<8x384xf32>
    %163 = arith.negf %162 : vector<8x384xf32>
    %164 = math.exp %163 : vector<8x384xf32>
    %cst_97 = arith.constant 1.000000e+00 : f32
    %165 = vector.broadcast %cst_97 : f32 to vector<8x384xf32>
    %166 = arith.addf %165, %164 : vector<8x384xf32>
    %167 = arith.divf %165, %166 : vector<8x384xf32>
    %168 = arith.mulf %162, %167 : vector<8x384xf32>
    %c0_98 = arith.constant 0 : index
    %c0_99 = arith.constant 0 : index
    %169 = vector.load %arg5[%c0_98, %c0_99] : memref<8x8xf32, #tpu.memory_space<vmem>>, vector<8x8xf32>
    %cst_100 = arith.constant dense<0.000000e+00> : vector<8x384xf32>
    %170 = tpu.matmul %169, %168, %cst_100 {dimension_numbers = #tpu.dot_dimension_numbers<[1], [0], [0], [1], [0, 0, 1, 1], [], []>} : vector<8x8xf32>, vector<8x384xf32>, vector<8x384xf32> -> vector<8x384xf32>
    %171 = vector.broadcast %0 : vector<1x384xf32> to vector<8x384xf32>
    %172 = arith.mulf %170, %171 : vector<8x384xf32>
    %173 = vector.shape_cast %172 : vector<8x384xf32> to vector<1x8x384xf32>
    %cst_101 = arith.constant dense<0.000000e+00> : vector<1xf32>
    %174 = vector.multi_reduction <add>, %173, %cst_101 [1, 2] : vector<1x8x384xf32> to vector<1xf32>
    %175 = vector.shape_cast %174 : vector<1xf32> to vector<1x1x1xf32>
    %176 = vector.extract %175[0, 0, 0] : f32 from vector<1x1x1xf32>
    %177 = arith.mulf %170, %172 : vector<8x384xf32>
    %178 = vector.shape_cast %177 : vector<8x384xf32> to vector<1x8x384xf32>
    %cst_102 = arith.constant dense<0.000000e+00> : vector<1xf32>
    %179 = vector.multi_reduction <add>, %178, %cst_102 [1, 2] : vector<1x8x384xf32> to vector<1xf32>
    %180 = vector.shape_cast %179 : vector<1xf32> to vector<1x1x1xf32>
    %181 = vector.extract %180[0, 0, 0] : f32 from vector<1x1x1xf32>
    %cst_103 = arith.constant 4.8828125E-4 : f32
    %182 = arith.mulf %176, %cst_103 : f32
    %cst_104 = arith.constant 4.8828125E-4 : f32
    %183 = arith.mulf %181, %cst_104 : f32
    %184 = arith.mulf %182, %182 : f32
    %185 = arith.subf %183, %184 : f32
    %cst_105 = arith.constant 9.99999974E-6 : f32
    %186 = arith.addf %185, %cst_105 : f32
    %187 = math.rsqrt %186 : f32
    %188 = vector.broadcast %187 : f32 to vector<8x1xf32>
    %189 = arith.mulf %4, %188 : vector<8x1xf32>
    %190 = vector.broadcast %182 : f32 to vector<8x1xf32>
    %191 = arith.mulf %190, %189 : vector<8x1xf32>
    %192 = arith.subf %5, %191 : vector<8x1xf32>
    %193 = vector.broadcast %189 : vector<8x1xf32> to vector<8x384xf32>
    %194 = arith.mulf %170, %193 : vector<8x384xf32>
    %195 = vector.broadcast %192 : vector<8x1xf32> to vector<8x384xf32>
    %196 = arith.addf %194, %195 : vector<8x384xf32>
    %197 = arith.negf %196 : vector<8x384xf32>
    %198 = math.exp %197 : vector<8x384xf32>
    %cst_106 = arith.constant 1.000000e+00 : f32
    %199 = vector.broadcast %cst_106 : f32 to vector<8x384xf32>
    %200 = arith.addf %199, %198 : vector<8x384xf32>
    %201 = arith.divf %199, %200 : vector<8x384xf32>
    %202 = arith.mulf %196, %201 : vector<8x384xf32>
    %c1_107 = arith.constant 1 : index
    %c0_108 = arith.constant 0 : index
    %c0_109 = arith.constant 0 : index
    %203 = vector.load %arg7[%c1_107, %c0_108, %c0_109] : memref<2x8x384xf32, #tpu.memory_space<vmem>>, vector<1x8x384xf32>
    %204 = vector.shape_cast %203 : vector<1x8x384xf32> to vector<8x384xf32>
    %205 = vector.shape_cast %202 : vector<8x384xf32> to vector<1x8x384xf32>
    tpu.vector_store %arg7[%c1_107, %c0_108, %c0_109], %205 {strides = array<i32>} : memref<2x8x384xf32, #tpu.memory_space<vmem>>, vector<1x8x384xf32>,
    return
  }
  func.func @transform_0(%arg0: i32) -> (i32, i32, i32) {
    %c0_i32 = arith.constant 0 : i32
    %c0_i32_0 = arith.constant 0 : i32
    %c0_i32_1 = arith.constant 0 : i32
    return %arg0, %c0_i32, %c0_i32_0 : i32, i32, i32
  }
  func.func @transform_1(%arg0: i32) -> (i32, i32, i32) {
    %c0_i32 = arith.constant 0 : i32
    %c0_i32_0 = arith.constant 0 : i32
    %c0_i32_1 = arith.constant 0 : i32
    return %arg0, %c0_i32, %c0_i32_0 : i32, i32, i32
  }
  func.func @transform_2(%arg0: i32) -> (i32, i32) {
    %c0_i32 = arith.constant 0 : i32
    %c0_i32_0 = arith.constant 0 : i32
    %c0_i32_1 = arith.constant 0 : i32
    return %c0_i32, %c0_i32_0 : i32, i32
  }
  func.func @transform_3(%arg0: i32) -> (i32, i32, i32) {
    %c0_i32 = arith.constant 0 : i32
    %c0_i32_0 = arith.constant 0 : i32
    %c0_i32_1 = arith.constant 0 : i32
    %c0_i32_2 = arith.constant 0 : i32
    return %c0_i32, %c0_i32_0, %c0_i32_1 : i32, i32, i32
  }
  func.func @transform_4(%arg0: i32) -> (i32, i32) {
    %c0_i32 = arith.constant 0 : i32
    %c0_i32_0 = arith.constant 0 : i32
    %c0_i32_1 = arith.constant 0 : i32
    return %c0_i32, %c0_i32_0 : i32, i32
  }
  func.func @transform_5(%arg0: i32) -> (i32, i32) {
    %c0_i32 = arith.constant 0 : i32
    %c0_i32_0 = arith.constant 0 : i32
    %c0_i32_1 = arith.constant 0 : i32
    return %c0_i32, %c0_i32_0 : i32, i32
  }
  func.func @transform_6(%arg0: i32) -> (i32, i32, i32) {
    %c0_i32 = arith.constant 0 : i32
    %c0_i32_0 = arith.constant 0 : i32
    %c0_i32_1 = arith.constant 0 : i32
    return %arg0, %c0_i32, %c0_i32_0 : i32, i32, i32
  }
}

</mosaic_0001>

<bundles_post_ra>
// kernel: up_forward.1
= control target key start
LH: loop header
LB: loop body
LE: loop exit
PB: predicated region body
PF: predicated region fallthrough
CT: control target
= control target key end

     0   :  { %vm39_vm0 = vcmask 1043456   ;;  %v2636_v1 = vmov 0.0   ;;  %s2637_s23 = smov 127   ;;  %vm2638_vm1 = vmmov 0   ;;  %vm35_vm2 = vcmask 31744   ;;  %s2639_s8 = smov 111   ;;  %s3060_s0 = inlined_call_operand.vmem [shape: f32[2,4,512], index: 0, kind: input, shape index: {}]   ;;  %s3061_s3 = inlined_call_operand.vmem [shape: f32[5,8,4], index: 3, kind: input, shape index: {}]   ;;  %s3062_s1 = inlined_call_operand.vmem [shape: f32[2,4,384], index: 1, kind: input, shape index: {}]   ;;  %s3063_s5 = inlined_call_operand.vmem [shape: f32[8,5], index: 5, kind: input, shape index: {}]   ;;  %s3064_s2 = inlined_call_operand.vmem [shape: f32[1,384], index: 2, kind: input, shape index: {}]   ;;  %s3065_s4 = inlined_call_operand.vmem [shape: f32[8,8], index: 4, kind: input, shape index: {}]   ;;  %s3066_s6 = inlined_call_operand.vmem [shape: f32[2,8,384], index: 6, kind: output, shape index: {}]  }
   0x1   :  { %v342_v0 = vld [vmem:[%s3060_s0] sm:$0xff]  ;;  %110 = vmatprep.mubr.f32.mxu0 %v2636_v1  ;;  %2454 = vmatprep.subr.mxu1 %v2636_v1  ;;  %v31_v4 = vld [vmem:[%s3060_s0 + $0x8] sm:$0xf]  ;;  %v2640_v11 = vmov 0   ;;  %s2641_s13 = smov 110   ;;  %vm356_vm3 = vcmask 1039360   ;;  %v868_v42 = vlaneseq }
   0x2   :  { %348 = vrot.lane.b32.xlu1 %v342_v0, %s2637_s23  ;;  %v346_v2 = vcombine.high %v342_v0, %v342_v0  ;;  %v26_v3 = vld [vmem:[%s3062_s1] sm:$0xff]  ;;  %2456 = vmatprep.mubr.msk.f32.mxu1 %vm2638_vm1, %v2636_v1  ;;  %v2699_v5 = vld [vmem:[%s3061_s3 + $0x8] sm:$0xff]  ;;  %v2755_v18 = vld [vmem:[%s3061_s3 + $0x10] sm:$0xff]  ;;  %vm529_vm4 = vcmask 908288   ;;  %vm702_vm5 = vcmask 900096   ;;  %s2644_s9 = smov 1  }
   0x3   :  { %v189_v6 = vcombine.high %v26_v3, %v26_v3  ;;  %2455 = vmatpush3.msk.msra.mxu1 %vm39_vm0, %v31_v4  ;;  %v343_v7 = vld [vmem:[%s3060_s0 + $0x8] sm:$0xff]  ;;  %v2727_v10 = vld [vmem:[%s3061_s3] sm:$0xff]  ;;  %2565 = vset.pattern.permute.xlu0 %v2640_v11  ;;  %v2771_v27 = vld [vmem:[%s3061_s3 + $0x18] sm:$0xff]  ;;  %v869_v44 = vshrl.u32 %v868_v42, 7  ;;  %vm966_vm6 = vcmask 64512  }
   0x4   :  { %350 = vrot.lane.b32.xlu0 %v346_v2, %s2637_s23  ;;  %2344 = vmatprep.subr.msk.mxu0 %vm39_vm0, %v346_v2  ;;  %v27_v8 = vld [vmem:[%s3062_s1 + $0x8] sm:$0xf]  ;;  %v347_v9 = vcombine.high %v343_v7, %v343_v7  ;;  %v2748_v12 = vld [vmem:[%s3063_s5] sm:$0xff] }
   0x5   :  { %2345 = vmatpush1.msk.msra.mxu0 %vm39_vm0, %v342_v0  ;;  %2457 = vmatmul.mubr.msk.f32.vlgmr.msra.gmra.mrb[0].mxu1 %vm35_vm2, %v2699_v5  ;;  %v2796_v35 = vld [vmem:[%s3061_s3 + $0x20] sm:$0xff]  ;;  %v870_v48 = vsub.s32 0, %v869_v44  ;;  %v874_v52 = vsub.s32 1, %v869_v44  ;;  %v878_v53 = vsub.s32 2, %v869_v44  ;;  %v2849_v44 = vld [vmem:[%s3060_s0 + $0x10] sm:$0xff] }
   0x6   :  { %523 = vrot.lane.b32.xlu1 %v346_v2, %s2639_s8  ;;  %2346 = vmatmul.mubr.msk.f32.vlgmr.msra.gmra.mrb[0].mxu0 %vm35_vm2, %v2699_v5  ;;  %v23_v51 = vld [vmem:[%s3064_s2] sm:$0x7] }
   0x7   :  { %2349 = vmatprep.subr.msk.mxu0 %vm39_vm0, %v189_v6  ;;  %263 = vmatprep.mubr.f32.mxu0 %v2636_v1  ;;  %v2813_v56 = vrot.slane %v23_v51, %v870_v48  ;;  %v2815_v59 = vrot.slane %v23_v51, %v874_v52  ;;  %v2817_v61 = vrot.slane %v23_v51, %v878_v53 }
   0x8   :  { %352 = vrot.lane.b32.xlu0 %v343_v7, %s2637_s23  ;;  %2350 = vmatpush1.msk.msra.mxu0 %vm39_vm0, %v26_v3 }
   0x9   :  { %2459 = vmatprep.subr.mxu1 %v2636_v1  ;;  %2461 = vmatprep.mubr.msk.f32.mxu1 %vm2638_vm1, %v2636_v1 }
   0xa   :  { %521 = vrot.lane.b32.xlu1 %v342_v0, %s2639_s8  ;;  %2460 = vmatpush3.msk.msra.mxu1 %vm39_vm0, %v27_v8 }
   0xb   :  { %2462 = vmatmul.mubr.msk.f32.vlgmr.msra.gmra.mrb[2].mxu1 %vm35_vm2, %v2727_v10  ;;  %2464 = vmatprep.subr.mxu1 %v2636_v1 }
   0xc   :  { %525 = vrot.lane.b32.xlu0 %v343_v7, %s2639_s8  ;;  %2466 = vmatprep.mubr.msk.f32.mxu1 %vm2638_vm1, %v2636_v1 }
   0xe   :  { %527 = vrot.lane.b32.xlu1 %v347_v9, %s2639_s8  ;;  %2351 = vmatmul.mubr.msk.f32.vlgmr.msra.gmra.mrb[0].mxu0 %vm35_vm2, %v2727_v10 }
   0xf   :  { %433 = vmatprep.mubr.f32.mxu0 %v2636_v1 }
  0x10   :  { %354 = vrot.lane.b32.xlu0 %v347_v9, %s2637_s23 }
  0x12   :  { %698 = vrot.lane.b32.xlu1 %v343_v7, %s2641_s13 }
  0x14   :  { %696 = vrot.lane.b32.xlu0 %v346_v2, %s2641_s13 }
  0x16   :  { %700 = vrot.lane.b32.xlu1 %v347_v9, %s2641_s13 }
  0x18   :  { %694 = vrot.lane.b32.xlu0 %v342_v0, %s2641_s13 }
  0x1c   :  { %861 = vperm.xlu0 %2565, %v2748_v12  }
  0x74   :  { %v349_v13 = vpop.permute.xlu1 %348 }
  0x76   :  { %v351_v14 = vpop.permute.xlu0 %350 }
  0x77   :  { %v357_v19 = vsel %vm356_vm3, %v349_v13, %v351_v14 }
  0x78   :  { %v524_v15 = vpop.permute.xlu1 %523 }
  0x7a   :  { %v353_v16 = vpop.permute.xlu0 %352 }
  0x7b   :  { %v358_v17 = vsel %vm356_vm3, %v351_v14, %v353_v16 }
  0x7c   :  { %v522_v20 = vpop.permute.xlu1 %521  ;;  %2355 = vmatprep.subr.msk.mxu0 %vm39_vm0, %v358_v17 }
  0x7d   :  { %2356 = vmatpush1.msk.msra.mxu0 %vm39_vm0, %v357_v19  ;;  %v530_v23 = vsel %vm529_vm4, %v522_v20, %v524_v15 }
  0x7e   :  { %v526_v21 = vpop.permute.xlu0 %525  ;;  %2357 = vmatmul.mubr.msk.f32.vlgmr.msra.gmra.mrb[0].mxu0 %vm35_vm2, %v2755_v18 }
  0x7f   :  { %v531_v22 = vsel %vm529_vm4, %v524_v15, %v526_v21  ;;  %606 = vmatprep.mubr.f32.mxu0 %v2636_v1 }
  0x80   :  { %v528_v24 = vpop.permute.xlu1 %527  ;;  %2361 = vmatprep.subr.msk.mxu0 %vm39_vm0, %v531_v22 }
  0x81   :  { %2362 = vmatpush1.msk.msra.mxu0 %vm39_vm0, %v530_v23  ;;  %v532_v29 = vsel %vm529_vm4, %v526_v21, %v528_v24 }
  0x82   :  { %v355_v25 = vpop.permute.xlu0 %354 }
  0x83   :  { %v359_v26 = vsel %vm356_vm3, %v353_v16, %v355_v25 }
  0x84   :  { %2465 = vmatpush3.msk.msra.mxu1 %vm39_vm0, %v359_v26  ;;  %v699_v28 = vpop.permute.xlu1 %698  ;;  %v2642_v26 = vmov 1  }
  0x85   :  { %2467 = vmatmul.mubr.msk.f32.vlgmr.msra.gmra.mrb[4].mxu1 %vm35_vm2, %v2755_v18  ;;  %2469 = vmatprep.subr.mxu1 %v2636_v1 }
  0x86   :  { %v697_v30 = vpop.permute.xlu0 %696  ;;  %2363 = vmatmul.mubr.msk.f32.vlgmr.msra.gmra.mrb[0].mxu0 %vm35_vm2, %v2771_v27  ;;  %2470 = vmatpush3.msk.msra.mxu1 %vm39_vm0, %v532_v29 }
  0x87   :  { %v704_v31 = vsel %vm702_vm5, %v697_v30, %v699_v28  ;;  %2471 = vmatprep.mubr.msk.f32.mxu1 %vm2638_vm1, %v2636_v1  ;;  %2474 = vmatprep.subr.mxu1 %v2636_v1 }
  0x88   :  { %2367 = vmatprep.subr.msk.mxu0 %vm39_vm0, %v704_v31  ;;  %v701_v32 = vpop.permute.xlu1 %700  ;;  %779 = vmatprep.mubr.f32.mxu0 %v2636_v1 }
  0x89   :  { %2472 = vmatmul.mubr.msk.f32.vlgmr.msra.gmra.mrb[6].mxu1 %vm35_vm2, %v2771_v27  ;;  %v705_v33 = vsel %vm702_vm5, %v699_v28, %v701_v32  ;;  %2566 = vset.pattern.permute.xlu0 %v2642_v26 }
  0x8a   :  { %v695_v34 = vpop.permute.xlu0 %694  ;;  %2475 = vmatpush3.msk.msra.mxu1 %vm39_vm0, %v705_v33  ;;  %2476 = vmatprep.mubr.msk.f32.mxu1 %vm2638_vm1, %v2636_v1 }
  0x8b   :  { %v703_v36 = vsel %vm702_vm5, %v695_v34, %v697_v30  ;;  %2479 = vmatprep.subr.mxu1 %v2636_v1 }
  0x8c   :  { %2368 = vmatpush1.msk.msra.mxu0 %vm39_vm0, %v703_v36  ;;  %v2643_v36 = vmov 2  }
  0x8d   :  { %2477 = vmatmul.mubr.msk.f32.vlgmr.msra.gmra.mrb[8].mxu1 %vm35_vm2, %v2796_v35  ;;  %2567 = vset.pattern.permute.xlu1 %v2643_v36 }
  0x8e   :  { %2369 = vmatmul.mubr.msk.f32.vlgmr.msra.gmra.mrb[0].mxu0 %vm35_vm2, %v2796_v35  ;;  %2481 = vmatprep.mubr.msk.f32.mxu1 %vm2638_vm1, %v2636_v1 }
  0x8f   :  { %1034 = vmatprep.mubr.f32.mxu0 %v2636_v1 }
  0x9b   :  { %v2811_v54 = vpop.permute.xlu0 %861 }
  0xd8   :  { %v183_v37 = vpop.f32.mrb[0].mxu1 }
  0xd9   :  { %v2458_v38 = vpop.f32.mrb[1].mxu1 }
  0xde   :  { %v336_v39 = vpop.f32.mrb[2].mxu1 }
  0xdf   :  { %v337_v40 = vadd.f32 %v336_v39, %v183_v37  ;;  %v2463_v41 = vpop.f32.mrb[3].mxu1 }
  0xe0   :  { %v2397_v41 = vld [vmem:[%s3060_s0 + $0x18] sm:$0xff] }
  0xe1   :  { %v1516_v42 = vcombine.high %v2397_v41, %v2397_v41 }
 0x158   :  { %v506_v43 = vpop.f32.mrb[4].mxu1 }
 0x159   :  { %v512_v45 = vadd.f32 %v506_v43, %v337_v40  ;;  %v2468_v46 = vpop.f32.mrb[5].mxu1 }
 0x15a   :  { %v1515_v46 = vcombine.high %v2849_v44, %v2849_v44 }
 0x15c   :  { %v679_v47 = vpop.f32.mrb[6].mxu1 }
 0x15d   :  { %v685_v49 = vadd.f32 %v679_v47, %v512_v45  ;;  %v2473_v50 = vpop.f32.mrb[7].mxu1 }
 0x160   :  { %v852_v55 = vpop.f32.mrb[8].mxu1 }
 0x161   :  { %v858_v57 = vadd.f32 %v852_v55, %v685_v49  ;;  %v781_v58 = vpop.f32.mrb[0].mxu0  ;;  %v2478_v60 = vpop.f32.mrb[9].mxu1 }
 0x162   :  { %v2820_v62 = vadd.f32 %v2811_v54, %v781_v58  ;;  %v783_v63 = vpop.f32.mrb[1].mxu0 }
 0x163   :  { %v2823_v0 = vadd.f32 %v2811_v54, %v783_v63  ;;  %v2826_v2 = vadd.f32 %v2811_v54, %v858_v57 }
 0x164   :  { %v883_v3 = vmul.f32 %v2813_v56, %v2820_v62 }
 0x165   :  { %v884_v4 = vmul.f32 %v2815_v59, %v2823_v0  ;;  %v885_v6 = vmul.f32 %v2817_v61, %v2826_v2 }
 0x166   :  { %v897_v7 = vmul.f32 %v883_v3, %v2820_v62 }
 0x167   :  { %v898_v8 = vmul.f32 %v884_v4, %v2823_v0  ;;  %v886_v9 = vadd.f32 %v884_v4, %v883_v3  ;;  %v899_v13 = vmul.f32 %v885_v6, %v2826_v2 }
 0x169   :  { %v887_v11 = vadd.f32 %v886_v9, %v885_v6  ;;  %v900_v14 = vadd.f32 %v898_v8, %v897_v7 }
 0x16b   :  { %888 = vadd.xlane.f32.xlu1 %v887_v11  ;;  %v901_v15 = vadd.f32 %v900_v14, %v899_v13 }
 0x16d   :  { %902 = vadd.xlane.f32.xlu0 %v901_v15 }
 0x1f8   :  { %v889_v16 = vpop.xlane.xlu1 %888 }
 0x1f9   :  { %v890_v17 = vrot.slane %v889_v16, 4 }
 0x1fa   :  { %v903_v19 = vpop.xlane.xlu0 %902 }
 0x1fb   :  { %v891_v20 = vadd.f32 %v890_v17, %v889_v16  ;;  %v904_v21 = vrot.slane %v903_v19, 4 }
 0x1fd   :  { %v892_v22 = vrot.slane %v891_v20, 2  ;;  %v905_v23 = vadd.f32 %v904_v21, %v903_v19 }
 0x1ff   :  { %v906_v24 = vrot.slane %v905_v23, 2  ;;  %v893_v25 = vadd.f32 %v892_v22, %v891_v20  ;;  %v2876_v20 = vld [vmem:[%s3065_s4] sm:$0xff]  ;;  %v2384_v22 = vld [vmem:[%s3060_s0 + $0x18] sm:$0xf] }
 0x201   :  { %v894_v28 = vrot.slane %v893_v25, 1  ;;  %v907_v29 = vadd.f32 %v906_v24, %v905_v23  ;;  %v2380_v24 = vld [vmem:[%s3062_s1 + $0xc] sm:$0xff] }
 0x203   :  { %v895_v30 = vadd.f32 %v894_v28, %v893_v25  ;;  %v908_v31 = vrot.slane %v907_v29, 1  ;;  %v1359_v25 = vcombine.high %v2380_v24, %v2380_v24 }
 0x205   :  { %2530 = vpush %v895_v30  ;;  %v909_v32 = vadd.f32 %v908_v31, %v907_v29 }
 0x207   :  { %2532 = vpush %v909_v32 }
 0x236   :  { %s2531_s2 = spop %2530 }
 0x237   :  { %s911_s22 = smul.f32 0.00048828125, %s2531_s2 }
 0x238   :  { %s2533_s24 = spop %2532 }
 0x239   :  { %s913_s25 = smul.f32 %s911_s22, %s911_s22  ;;  %v921_v39 = vstv %s911_s22 }
 0x23a   :  { %s912_s26 = smul.f32 0.00048828125, %s2533_s24 }
 0x23c   :  { %s914_s27 = ssub.f32 %s912_s26, %s913_s25 }
 0x23e   :  { %s915_s28 = sadd.f32 1e-05, %s914_s27 }
 0x240   :  { %v916_v33 = vstv %s915_s28 }
 0x241   :  { %2580 = vrsqrt.f32 %v916_v33 }
 0x24b   :  { %v2581_v34 = vpop.eup %2580 }
 0x24c   :  { %2534 = vpush %v2581_v34 }
 0x27d   :  { %s2535_s29 = spop %2534 }
 0x27e   :  { %v919_v37 = vstv %s2535_s29 }
 0x27f   :  { %v920_v38 = vmul.f32 %v919_v37, %v2748_v12 }
 0x281   :  { %v922_v40 = vmul.f32 %v921_v39, %v920_v38  ;;  %930 = vperm.xlu0 %2566, %v920_v38  }
 0x283   :  { %924 = vrot.lane.b32.xlu1 %v922_v40, %s2644_s9 }
 0x285   :  { %1694 = vrot.lane.b32.xlu0 %v1516_v42, %s2639_s8 }
 0x289   :  { %1863 = vrot.lane.b32.xlu0 %v2397_v41, %s2641_s13 }
 0x28d   :  { %1865 = vrot.lane.b32.xlu0 %v1516_v42, %s2641_s13 }
 0x2f5   :  { %v925_v43 = vpop.permute.xlu1 %924 }
 0x2f6   :  { %v927_v45 = vsub.f32 %v2748_v12, %v925_v43 }
 0x2f8   :  { %938 = vperm.xlu1 %2567, %v927_v45  }
 0x2fc   :  { %1519 = vrot.lane.b32.xlu1 %v1515_v46, %s2637_s23 }
 0x2fd   :  { %2568 = vset.pattern.permute.xlu1 %v2642_v26  ;;  %v2381_v26 = vld [vmem:[%s3062_s1 + $0x14] sm:$0xf] }
 0x300   :  { %1521 = vrot.lane.b32.xlu1 %v2397_v41, %s2637_s23  ;;  %v931_v47 = vpop.permute.xlu0 %930 }
 0x301   :  { %v933_v48 = vmul.f32 %v931_v47, %v2820_v62  ;;  %v934_v49 = vmul.f32 %v931_v47, %v2823_v0  ;;  %v935_v50 = vmul.f32 %v931_v47, %v2826_v2 }
 0x304   :  { %1517 = vrot.lane.b32.xlu1 %v2849_v44, %s2637_s23  ;;  %v1695_v23 = vpop.permute.xlu0 %1694 }
 0x308   :  { %1690 = vrot.lane.b32.xlu1 %v1515_v46, %s2639_s8  ;;  %v1864_v29 = vpop.permute.xlu0 %1863 }
 0x30c   :  { %1692 = vrot.lane.b32.xlu1 %v2397_v41, %s2639_s8  ;;  %v1866_v33 = vpop.permute.xlu0 %1865 }
 0x30d   :  { %v1869_v37 = vsel %vm702_vm5, %v1864_v29, %v1866_v33 }
 0x310   :  { %1688 = vrot.lane.b32.xlu1 %v2849_v44, %s2639_s8 }
 0x314   :  { %1523 = vrot.lane.b32.xlu1 %v1516_v42, %s2637_s23 }
 0x318   :  { %1861 = vrot.lane.b32.xlu1 %v1515_v46, %s2641_s13 }
 0x31c   :  { %1859 = vrot.lane.b32.xlu1 %v2849_v44, %s2641_s13 }
 0x377   :  { %v939_v51 = vpop.permute.xlu1 %938 }
 0x378   :  { %v941_v52 = vadd.f32 %v939_v51, %v933_v48  ;;  %v942_v53 = vadd.f32 %v939_v51, %v934_v49  ;;  %v943_v55 = vadd.f32 %v939_v51, %v935_v50 }
 0x37a   :  { %v2372_v57 = vmul.f32 -1.442695, %v941_v52  ;;  %v2373_v58 = vmul.f32 -1.442695, %v942_v53  ;;  %v2374_v60 = vmul.f32 -1.442695, %v943_v55 }
 0x37b   :  { %v2869_v63 = vpop.permute.xlu1 %1519 }
 0x37c   :  { %2582 = vpow2.f32 %v2372_v57 }
 0x37d   :  { %2584 = vpow2.f32 %v2373_v58 }
 0x37e   :  { %2586 = vpow2.f32 %v2374_v60 }
 0x37f   :  { %v1522_v3 = vpop.permute.xlu1 %1521 }
 0x380   :  { %v1526_v31 = vsel %vm356_vm3, %v2869_v63, %v1522_v3 }
 0x383   :  { %v1518_v4 = vpop.permute.xlu1 %1517 }
 0x384   :  { %v1525_v32 = vsel %vm356_vm3, %v1518_v4, %v2869_v63 }
 0x386   :  { %v2583_v6 = vpop.eup %2582 }
 0x387   :  { %v2585_v62 = vpop.eup %2584  ;;  %v953_v7 = vadd.f32 1.0, %v2583_v6  ;;  %v2871_v9 = vpop.permute.xlu1 %1690 }
 0x388   :  { %v2587_v0 = vpop.eup %2586  ;;  %v954_v8 = vadd.f32 1.0, %v2585_v62 }
 0x389   :  { %v955_v2 = vadd.f32 1.0, %v2587_v0  ;;  %2588 = vrcp.f32 %v953_v7 }
 0x38a   :  { %2590 = vrcp.f32 %v954_v8 }
 0x38b   :  { %2592 = vrcp.f32 %v955_v2  ;;  %v1693_v11 = vpop.permute.xlu1 %1692 }
 0x38c   :  { %v1697_v34 = vsel %vm529_vm4, %v2871_v9, %v1693_v11 }
 0x38f   :  { %v1689_v21 = vpop.permute.xlu1 %1688 }
 0x390   :  { %v1696_v38 = vsel %vm529_vm4, %v1689_v21, %v2871_v9 }
 0x393   :  { %v2589_v13 = vpop.eup %2588  ;;  %v1524_v28 = vpop.permute.xlu1 %1523 }
 0x394   :  { %v2591_v14 = vpop.eup %2590  ;;  %v962_v15 = vmul.f32 %v2589_v13, %v941_v52  ;;  %v1527_v30 = vsel %vm356_vm3, %v1522_v3, %v1524_v28 }
 0x395   :  { %v2593_v16 = vpop.eup %2592  ;;  %v963_v17 = vmul.f32 %v2591_v14, %v942_v53 }
 0x396   :  { %v964_v19 = vmul.f32 %v2593_v16, %v943_v55 }
 0x397   :  { %970 = vmatprep.subr.mxu0 %v963_v17 }
 0x398   :  { %2480 = vmatpush3.msra.mxu1 %v964_v19  ;;  %971 = vmatpush1.msra.mxu0 %v962_v15 }
 0x399   :  { %2482 = vmatmul.mubr.msk.f32.vlgmr.msra.gmra.mrb[10].mxu1 %vm966_vm6, %v2876_v20  ;;  %2375 = vmatmul.mubr.msk.f32.vlgmr.msra.gmra.mrb[2].mxu0 %vm966_vm6, %v2876_v20 }
 0x39a   :  { %2484 = vmatprep.subr.mxu1 %v2636_v1  ;;  %2385 = vmatprep.subr.msk.mxu0 %vm39_vm0, %v1515_v46 }
 0x39b   :  { %2485 = vmatpush3.msk.msra.mxu1 %vm39_vm0, %v2384_v22  ;;  %2486 = vmatprep.mubr.msk.f32.mxu1 %vm2638_vm1, %v2636_v1 }
 0x39c   :  { %2386 = vmatpush1.msk.msra.mxu0 %vm39_vm0, %v2849_v44  ;;  %1280 = vmatprep.mubr.f32.mxu0 %v2636_v1 }
 0x39d   :  { %2487 = vmatmul.mubr.msk.f32.vlgmr.msra.gmra.mrb[12].mxu1 %vm35_vm2, %v2699_v5  ;;  %2387 = vmatmul.mubr.msk.f32.vlgmr.msra.gmra.mrb[4].mxu0 %vm35_vm2, %v2699_v5  ;;  %v1698_v5 = vsel %vm529_vm4, %v1693_v11, %v1695_v23 }
 0x39e   :  { %2489 = vmatprep.subr.mxu1 %v2636_v1  ;;  %2491 = vmatprep.mubr.msk.f32.mxu1 %vm2638_vm1, %v2636_v1 }
 0x39f   :  { %2490 = vmatpush3.msk.msra.mxu1 %vm39_vm0, %v2381_v26  ;;  %2390 = vmatprep.subr.msk.mxu0 %vm39_vm0, %v1359_v25 }
 0x3a0   :  { %2494 = vmatprep.subr.mxu1 %v2636_v1  ;;  %2391 = vmatpush1.msk.msra.mxu0 %vm39_vm0, %v2380_v24 }
 0x3a1   :  { %2492 = vmatmul.mubr.msk.f32.vlgmr.msra.gmra.mrb[14].mxu1 %vm35_vm2, %v2727_v10  ;;  %1433 = vmatprep.mubr.f32.mxu0 %v2636_v1 }
 0x3a2   :  { %2495 = vmatpush3.msk.msra.mxu1 %vm39_vm0, %v1527_v30  ;;  %2496 = vmatprep.mubr.msk.f32.mxu1 %vm2638_vm1, %v2636_v1 }
 0x3a3   :  { %2499 = vmatprep.subr.mxu1 %v2636_v1  ;;  %2398 = vmatprep.subr.msk.mxu0 %vm39_vm0, %v1526_v31 }
 0x3a5   :  { %2497 = vmatmul.mubr.msk.f32.vlgmr.msra.gmra.mrb[16].mxu1 %vm35_vm2, %v2755_v18  ;;  %2392 = vmatmul.mubr.msk.f32.vlgmr.msra.gmra.mrb[4].mxu0 %vm35_vm2, %v2727_v10  ;;  %v1862_v10 = vpop.permute.xlu1 %1861 }
 0x3a6   :  { %2500 = vmatpush3.msk.msra.mxu1 %vm39_vm0, %v1698_v5  ;;  %2501 = vmatprep.mubr.msk.f32.mxu1 %vm2638_vm1, %v2636_v1  ;;  %v1868_v39 = vsel %vm702_vm5, %v1862_v10, %v1864_v29 }
 0x3a7   :  { %2504 = vmatprep.subr.mxu1 %v2636_v1  ;;  %2399 = vmatpush1.msk.msra.mxu0 %vm39_vm0, %v1525_v32 }
 0x3a8   :  { %1601 = vmatprep.mubr.f32.mxu0 %v2636_v1  ;;  %2406 = vmatprep.subr.msk.mxu0 %vm39_vm0, %v1697_v34 }
 0x3a9   :  { %2502 = vmatmul.mubr.msk.f32.vlgmr.msra.gmra.mrb[18].mxu1 %vm35_vm2, %v2771_v27  ;;  %v1860_v40 = vpop.permute.xlu1 %1859 }
 0x3aa   :  { %2505 = vmatpush3.msk.msra.mxu1 %vm39_vm0, %v1869_v37  ;;  %2506 = vmatprep.mubr.msk.f32.mxu1 %vm2638_vm1, %v2636_v1  ;;  %v1867_v41 = vsel %vm702_vm5, %v1860_v40, %v1862_v10 }
 0x3ab   :  { %2509 = vmatprep.subr.mxu1 %v2636_v1 }
 0x3ad   :  { %2507 = vmatmul.mubr.msk.f32.vlgmr.msra.gmra.mrb[20].mxu1 %vm35_vm2, %v2796_v35  ;;  %2400 = vmatmul.mubr.msk.f32.vlgmr.msra.gmra.mrb[4].mxu0 %vm35_vm2, %v2755_v18 }
 0x3ae   :  { %2407 = vmatpush1.msk.msra.mxu0 %vm39_vm0, %v1696_v38  ;;  %1772 = vmatprep.mubr.f32.mxu0 %v2636_v1 }
 0x3af   :  { %2414 = vmatprep.subr.msk.mxu0 %vm39_vm0, %v1868_v39  ;;  %2511 = vmatprep.mubr.msk.f32.mxu1 %vm2638_vm1, %v2636_v1 }
 0x3b5   :  { %2408 = vmatmul.mubr.msk.f32.vlgmr.msra.gmra.mrb[4].mxu0 %vm35_vm2, %v2771_v27 }
 0x3b6   :  { %2415 = vmatpush1.msk.msra.mxu0 %vm39_vm0, %v1867_v41  ;;  %1943 = vmatprep.mubr.f32.mxu0 %v2636_v1 }
 0x3bd   :  { %2416 = vmatmul.mubr.msk.f32.vlgmr.msra.gmra.mrb[4].mxu0 %vm35_vm2, %v2796_v35 }
 0x3be   :  { %2176 = vmatprep.mubr.f32.mxu0 %v2636_v1 }
 0x46c   :  { %v2964_v18 = vpop.f32.mrb[2].mxu0  ;;  %v2966_v42 = vpop.f32.mrb[10].mxu1 }
 0x46d   :  { %v1111_v43 = vmul.f32 %v2964_v18, %v2813_v56  ;;  %v2970_v44 = vpop.f32.mrb[3].mxu0  ;;  %v2483_v45 = vpop.f32.mrb[11].mxu1  ;;  %v1113_v46 = vmul.f32 %v2966_v42, %v2817_v61 }
 0x46e   :  { %v1112_v27 = vmul.f32 %v2970_v44, %v2815_v59 }
 0x46f   :  { %v1125_v35 = vmul.f32 %v1111_v43, %v2964_v18  ;;  %v1127_v51 = vmul.f32 %v1113_v46, %v2966_v42 }
 0x470   :  { %v1126_v1 = vmul.f32 %v1112_v27, %v2970_v44  ;;  %v1114_v47 = vadd.f32 %v1112_v27, %v1111_v43  ;;  %v1353_v48 = vpop.f32.mrb[12].mxu1 }
 0x471   :  { %v2488_v49 = vpop.f32.mrb[13].mxu1 }
 0x472   :  { %v1115_v50 = vadd.f32 %v1114_v47, %v1113_v46  ;;  %v1128_v52 = vadd.f32 %v1126_v1, %v1125_v35 }
 0x474   :  { %1116 = vadd.xlane.f32.xlu1 %v1115_v50  ;;  %v1129_v53 = vadd.f32 %v1128_v52, %v1127_v51  ;;  %v1506_v55 = vpop.f32.mrb[14].mxu1 }
 0x475   :  { %v1507_v57 = vadd.f32 %v1506_v55, %v1353_v48  ;;  %v2493_v58 = vpop.f32.mrb[15].mxu1 }
 0x476   :  { %1130 = vadd.xlane.f32.xlu0 %v1129_v53 }
 0x478   :  { %v1674_v60 = vpop.f32.mrb[16].mxu1 }
 0x479   :  { %v1680_v63 = vadd.f32 %v1674_v60, %v1507_v57  ;;  %v2498_v3 = vpop.f32.mrb[17].mxu1 }
 0x47c   :  { %v1845_v4 = vpop.f32.mrb[18].mxu1 }
 0x47d   :  { %v1851_v6 = vadd.f32 %v1845_v4, %v1680_v63  ;;  %v2503_v62 = vpop.f32.mrb[19].mxu1 }
 0x480   :  { %v2016_v7 = vpop.f32.mrb[20].mxu1 }
 0x481   :  { %v2022_v0 = vadd.f32 %v2016_v7, %v1851_v6  ;;  %v2508_v8 = vpop.f32.mrb[21].mxu1 }
 0x483   :  { %v2980_v2 = vadd.f32 %v2022_v0, %v2811_v54 }
 0x485   :  { %v2028_v17 = vmul.f32 %v2980_v2, %v2817_v61 }
 0x487   :  { %v2042_v24 = vmul.f32 %v2028_v17, %v2980_v2 }
 0x490   :  { %v1945_v9 = vpop.f32.mrb[4].mxu0 }
 0x491   :  { %v2983_v11 = vadd.f32 %v1945_v9, %v2811_v54  ;;  %v1947_v13 = vpop.f32.mrb[5].mxu0 }
 0x492   :  { %v2986_v14 = vadd.f32 %v1947_v13, %v2811_v54 }
 0x493   :  { %v2026_v15 = vmul.f32 %v2983_v11, %v2813_v56 }
 0x494   :  { %v2027_v16 = vmul.f32 %v2986_v14, %v2815_v59 }
 0x495   :  { %v2040_v19 = vmul.f32 %v2026_v15, %v2983_v11 }
 0x496   :  { %v2041_v21 = vmul.f32 %v2027_v16, %v2986_v14  ;;  %v2029_v22 = vadd.f32 %v2027_v16, %v2026_v15 }
 0x498   :  { %v2030_v23 = vadd.f32 %v2029_v22, %v2028_v17  ;;  %v2043_v25 = vadd.f32 %v2041_v21, %v2040_v19 }
 0x49a   :  { %2031 = vadd.xlane.f32.xlu0 %v2030_v23  ;;  %v2044_v54 = vadd.f32 %v2043_v25, %v2042_v24 }
 0x49c   :  { %2045 = vadd.xlane.f32.xlu1 %v2044_v54 }
 0x501   :  { %v1117_v26 = vpop.xlane.xlu1 %1116 }
 0x502   :  { %v1118_v28 = vrot.slane %v1117_v26, 4 }
 0x503   :  { %v1131_v29 = vpop.xlane.xlu0 %1130 }
 0x504   :  { %v1119_v30 = vadd.f32 %v1118_v28, %v1117_v26  ;;  %v1132_v31 = vrot.slane %v1131_v29, 4 }
 0x506   :  { %v1120_v5 = vrot.slane %v1119_v30, 2  ;;  %v1133_v32 = vadd.f32 %v1132_v31, %v1131_v29 }
 0x508   :  { %v1134_v33 = vrot.slane %v1133_v32, 2  ;;  %v1121_v34 = vadd.f32 %v1120_v5, %v1119_v30 }
 0x50a   :  { %v1122_v37 = vrot.slane %v1121_v34, 1  ;;  %v1135_v10 = vadd.f32 %v1134_v33, %v1133_v32 }
 0x50c   :  { %v1123_v38 = vadd.f32 %v1122_v37, %v1121_v34  ;;  %v1136_v39 = vrot.slane %v1135_v10, 1  ;;  %v2645_v37 = vmov 3  }
 0x50d   :  { %2570 = vset.pattern.permute.xlu0 %v2645_v37 }
 0x50e   :  { %2536 = vpush %v1123_v38  ;;  %v1137_v40 = vadd.f32 %v1136_v39, %v1135_v10 }
 0x510   :  { %2538 = vpush %v1137_v40 }
 0x527   :  { %v2032_v41 = vpop.xlane.xlu0 %2031 }
 0x528   :  { %v2033_v45 = vrot.slane %v2032_v41, 4 }
 0x529   :  { %v2046_v43 = vpop.xlane.xlu1 %2045 }
 0x52a   :  { %v2047_v27 = vrot.slane %v2046_v43, 4  ;;  %v2034_v46 = vadd.f32 %v2033_v45, %v2032_v41 }
 0x52c   :  { %v2048_v35 = vadd.f32 %v2047_v27, %v2046_v43  ;;  %v2035_v1 = vrot.slane %v2034_v46, 2 }
 0x52e   :  { %v2049_v47 = vrot.slane %v2048_v35, 2  ;;  %v2036_v49 = vadd.f32 %v2035_v1, %v2034_v46 }
 0x530   :  { %v2050_v50 = vadd.f32 %v2049_v47, %v2048_v35  ;;  %v2037_v51 = vrot.slane %v2036_v49, 1 }
 0x532   :  { %v2051_v52 = vrot.slane %v2050_v50, 1  ;;  %v2038_v55 = vadd.f32 %v2037_v51, %v2036_v49 }
 0x534   :  { %v2052_v57 = vadd.f32 %v2051_v52, %v2050_v50 }
 0x53f   :  { %s2537_s1 = spop %2536 }
 0x540   :  { %s2997_s16 = smul.f32 0.00048828125, %s2537_s1 }
 0x541   :  { %s2539_s17 = spop %2538 }
 0x542   :  { %s1141_s5 = smul.f32 %s2997_s16, %s2997_s16  ;;  %v1149_v63 = vstv %s2997_s16 }
 0x543   :  { %s1140_s18 = smul.f32 0.00048828125, %s2539_s17 }
 0x545   :  { %s1142_s19 = ssub.f32 %s1140_s18, %s1141_s5 }
 0x547   :  { %s1143_s20 = sadd.f32 1e-05, %s1142_s19 }
 0x549   :  { %v1144_v48 = vstv %s1143_s20 }
 0x54a   :  { %2594 = vrsqrt.f32 %v1144_v48 }
 0x554   :  { %v2595_v53 = vpop.eup %2594 }
 0x555   :  { %2540 = vpush %v2595_v53 }
 0x556   :  { %2542 = vpush %v2038_v55 }
 0x557   :  { %2544 = vpush %v2052_v57 }
 0x586   :  { %s2541_s3 = spop %2540 }
 0x587   :  { %v1147_v58 = vstv %s2541_s3  ;;  %s2543_s21 = spop %2542 }
 0x588   :  { %v3002_v60 = vmul.f32 %v1147_v58, %v2748_v12  ;;  %s2054_s2 = smul.f32 0.00048828125, %s2543_s21  ;;  %s2545_s22 = spop %2544 }
 0x589   :  { %s2055_s24 = smul.f32 0.00048828125, %s2545_s22 }
 0x58a   :  { %v3006_v3 = vmul.f32 %v1149_v63, %v3002_v60  ;;  %s2056_s25 = smul.f32 %s2054_s2, %s2054_s2  ;;  %v2064_v0 = vstv %s2054_s2 }
 0x58c   :  { %s2057_s26 = ssub.f32 %s2055_s24, %s2056_s25 }
 0x58e   :  { %s2058_s27 = sadd.f32 1e-05, %s2057_s26 }
 0x590   :  { %v2059_v4 = vstv %s2058_s27 }
 0x591   :  { %2596 = vrsqrt.f32 %v2059_v4 }
 0x59b   :  { %v2597_v6 = vpop.eup %2596 }
 0x59c   :  { %2546 = vpush %v2597_v6 }
 0x5cd   :  { %s2547_s28 = spop %2546 }
 0x5ce   :  { %v2062_v62 = vstv %s2547_s28 }
 0x5cf   :  { %v2063_v7 = vmul.f32 %v2062_v62, %v2748_v12  ;;  %v2646_v62 = vmov 4  }
 0x5d1   :  { %v2065_v8 = vmul.f32 %v2064_v0, %v2063_v7  ;;  %2073 = vperm.xlu1 %2568, %v2063_v7  }
 0x5d3   :  { %2067 = vrot.lane.b32.xlu0 %v2065_v8, %s2644_s9 }
 0x5d5   :  { %2569 = vset.pattern.permute.xlu1 %v2643_v36 }
 0x645   :  { %v2068_v9 = vpop.permute.xlu0 %2067 }
 0x646   :  { %v2070_v13 = vsub.f32 %v2748_v12, %v2068_v9 }
 0x648   :  { %2081 = vperm.xlu1 %2569, %v2070_v13  }
 0x64c   :  { %2571 = vset.pattern.permute.xlu1 %v2645_v37 }
 0x650   :  { %v2074_v15 = vpop.permute.xlu1 %2073 }
 0x651   :  { %v2076_v16 = vmul.f32 %v2074_v15, %v2983_v11  ;;  %v2077_v17 = vmul.f32 %v2074_v15, %v2986_v14  ;;  %v2078_v19 = vmul.f32 %v2074_v15, %v2980_v2 }
 0x6c7   :  { %v2082_v21 = vpop.permute.xlu1 %2081 }
 0x6c8   :  { %v2084_v22 = vadd.f32 %v2082_v21, %v2076_v16  ;;  %v2085_v23 = vadd.f32 %v2082_v21, %v2077_v17  ;;  %v2086_v24 = vadd.f32 %v2082_v21, %v2078_v19 }
 0x6ca   :  { %v2419_v25 = vmul.f32 -1.442695, %v2084_v22  ;;  %v2420_v54 = vmul.f32 -1.442695, %v2085_v23  ;;  %v2421_v26 = vmul.f32 -1.442695, %v2086_v24 }
 0x6cc   :  { %2598 = vpow2.f32 %v2419_v25 }
 0x6cd   :  { %2600 = vpow2.f32 %v2420_v54 }
 0x6ce   :  { %2602 = vpow2.f32 %v2421_v26 }
 0x6d6   :  { %v2599_v36 = vpop.eup %2598 }
 0x6d7   :  { %v2601_v28 = vpop.eup %2600  ;;  %v2096_v29 = vadd.f32 1.0, %v2599_v36 }
 0x6d8   :  { %v2603_v30 = vpop.eup %2602  ;;  %v2097_v31 = vadd.f32 1.0, %v2601_v28 }
 0x6d9   :  { %v2098_v11 = vadd.f32 1.0, %v2603_v30  ;;  %2604 = vrcp.f32 %v2096_v29 }
 0x6da   :  { %2606 = vrcp.f32 %v2097_v31 }
 0x6db   :  { %2608 = vrcp.f32 %v2098_v11 }
 0x6e3   :  { %v2605_v2 = vpop.eup %2604 }
 0x6e4   :  { %v2607_v14 = vpop.eup %2606  ;;  %v2105_v5 = vmul.f32 %v2605_v2, %v2084_v22 }
 0x6e5   :  { %v2609_v32 = vpop.eup %2608  ;;  %v2106_v33 = vmul.f32 %v2607_v14, %v2085_v23 }
 0x6e6   :  { %v2107_v34 = vmul.f32 %v2609_v32, %v2086_v24 }
 0x6e7   :  { %2112 = vmatprep.subr.mxu0 %v2106_v33 }
 0x6e8   :  { %2510 = vmatpush3.msra.mxu1 %v2107_v34  ;;  %2113 = vmatpush1.msra.mxu0 %v2105_v5 }
 0x6e9   :  { %2422 = vmatmul.mubr.msk.f32.vlgmr.msra.gmra.mrb[6].mxu0 %vm966_vm6, %v2876_v20  ;;  %2512 = vmatmul.mubr.msk.f32.vlgmr.msra.gmra.mrb[22].mxu1 %vm966_vm6, %v2876_v20 }
 0x7bc   :  { %v3019_v10 = vpop.f32.mrb[6].mxu0  ;;  %v3021_v38 = vpop.f32.mrb[22].mxu1 }
 0x7bd   :  { %v2253_v39 = vmul.f32 %v3019_v10, %v2813_v56  ;;  %v2180_v40 = vpop.f32.mrb[7].mxu0  ;;  %v2513_v41 = vpop.f32.mrb[23].mxu1  ;;  %v2255_v45 = vmul.f32 %v3021_v38, %v2817_v61 }
 0x7be   :  { %v2254_v43 = vmul.f32 %v2180_v40, %v2815_v59 }
 0x7bf   :  { %v2267_v27 = vmul.f32 %v2253_v39, %v3019_v10  ;;  %v2269_v1 = vmul.f32 %v2255_v45, %v3021_v38 }
 0x7c0   :  { %v2268_v20 = vmul.f32 %v2254_v43, %v2180_v40  ;;  %v2256_v46 = vadd.f32 %v2254_v43, %v2253_v39 }
 0x7c2   :  { %v2257_v35 = vadd.f32 %v2256_v46, %v2255_v45  ;;  %v2270_v47 = vadd.f32 %v2268_v20, %v2267_v27 }
 0x7c4   :  { %2258 = vadd.xlane.f32.xlu0 %v2257_v35  ;;  %v2271_v48 = vadd.f32 %v2270_v47, %v2269_v1 }
 0x7c6   :  { %2272 = vadd.xlane.f32.xlu1 %v2271_v48 }
 0x7da   :  { %1152 = vrot.lane.b32.xlu0 %v3006_v3, %s2644_s9 }
 0x7de   :  { %1158 = vperm.xlu0 %2570, %v3002_v60  }
 0x7e2   :  { %2573 = vset.pattern.permute.xlu0 %v2646_v62 }
 0x851   :  { %v2259_v56 = vpop.xlane.xlu0 %2258 }
 0x852   :  { %v2260_v59 = vrot.slane %v2259_v56, 4 }
 0x853   :  { %v2273_v49 = vpop.xlane.xlu1 %2272 }
 0x854   :  { %v2261_v61 = vadd.f32 %v2260_v59, %v2259_v56  ;;  %v2274_v50 = vrot.slane %v2273_v49, 4 }
 0x855   :  { %v1153_v13 = vpop.permute.xlu0 %1152 }
 0x856   :  { %v2262_v51 = vrot.slane %v2261_v61, 2  ;;  %v2275_v52 = vadd.f32 %v2274_v50, %v2273_v49  ;;  %v1155_v15 = vsub.f32 %v2748_v12, %v1153_v13 }
 0x858   :  { %v2276_v53 = vrot.slane %v2275_v52, 2  ;;  %v2263_v55 = vadd.f32 %v2262_v51, %v2261_v61 }
 0x85a   :  { %v2264_v57 = vrot.slane %v2263_v55, 1  ;;  %v2277_v58 = vadd.f32 %v2276_v53, %v2275_v52 }
 0x85c   :  { %v2265_v63 = vadd.f32 %v2264_v57, %v2263_v55  ;;  %v2278_v4 = vrot.slane %v2277_v58, 1 }
 0x85d   :  { %v1159_v21 = vpop.permute.xlu0 %1158 }
 0x85e   :  { %2548 = vpush %v2265_v63  ;;  %v2279_v6 = vadd.f32 %v2278_v4, %v2277_v58  ;;  %v1161_v25 = vmul.f32 %v1159_v21, %v2964_v18  ;;  %v1162_v54 = vmul.f32 %v1159_v21, %v2970_v44  ;;  %v1163_v26 = vmul.f32 %v1159_v21, %v2966_v42 }
 0x860   :  { %2550 = vpush %v2279_v6 }
 0x88f   :  { %s2549_s29 = spop %2548 }
 0x890   :  { %s2281_s30 = smul.f32 0.00048828125, %s2549_s29 }
 0x891   :  { %s2551_s7 = spop %2550 }
 0x892   :  { %s2283_s10 = smul.f32 %s2281_s30, %s2281_s30  ;;  %v2291_v8 = vstv %s2281_s30 }
 0x893   :  { %s2282_s11 = smul.f32 0.00048828125, %s2551_s7 }
 0x895   :  { %s2284_s23 = ssub.f32 %s2282_s11, %s2283_s10 }
 0x897   :  { %s2285_s8 = sadd.f32 1e-05, %s2284_s23 }
 0x899   :  { %v2286_v60 = vstv %s2285_s8 }
 0x89a   :  { %2610 = vrsqrt.f32 %v2286_v60 }
 0x8a4   :  { %v2611_v3 = vpop.eup %2610 }
 0x8a5   :  { %2552 = vpush %v2611_v3 }
 0x8d6   :  { %s2553_s12 = spop %2552 }
 0x8d7   :  { %v2289_v7 = vstv %s2553_s12 }
 0x8d8   :  { %v2290_v0 = vmul.f32 %v2289_v7, %v2748_v12 }
 0x8da   :  { %v2292_v9 = vmul.f32 %v2291_v8, %v2290_v0 }
 0x8dc   :  { %2294 = vrot.lane.b32.xlu1 %v2292_v9, %s2644_s9 }
 0x8e0   :  { %2300 = vperm.xlu1 %2571, %v2290_v0  }
 0x8e4   :  { %2572 = vset.pattern.permute.xlu1 %v2646_v62 }
 0x8e5   :  { %1166 = vperm.xlu1 %2572, %v1155_v15  }
 0x94e   :  { %v2295_v16 = vpop.permute.xlu1 %2294 }
 0x94f   :  { %v2297_v17 = vsub.f32 %v2748_v12, %v2295_v16 }
 0x951   :  { %2308 = vperm.xlu0 %2573, %v2297_v17  }
 0x95f   :  { %v2301_v19 = vpop.permute.xlu1 %2300 }
 0x960   :  { %v2303_v22 = vmul.f32 %v2301_v19, %v3019_v10  ;;  %v2304_v23 = vmul.f32 %v2301_v19, %v2180_v40  ;;  %v2305_v24 = vmul.f32 %v2301_v19, %v3021_v38 }
 0x964   :  { %v1167_v36 = vpop.permute.xlu1 %1166 }
 0x965   :  { %v1169_v28 = vadd.f32 %v1167_v36, %v1161_v25  ;;  %v1170_v29 = vadd.f32 %v1167_v36, %v1162_v54  ;;  %v1171_v30 = vadd.f32 %v1167_v36, %v1163_v26 }
 0x967   :  { %v2377_v31 = vmul.f32 -1.442695, %v1169_v28  ;;  %v2378_v12 = vmul.f32 -1.442695, %v1170_v29  ;;  %v2379_v11 = vmul.f32 -1.442695, %v1171_v30 }
 0x969   :  { %2612 = vpow2.f32 %v2377_v31 }
 0x96a   :  { %2614 = vpow2.f32 %v2378_v12 }
 0x96b   :  { %2616 = vpow2.f32 %v2379_v11 }
 0x973   :  { %v2613_v2 = vpop.eup %2612 }
 0x974   :  { %v2615_v14 = vpop.eup %2614  ;;  %v1181_v5 = vadd.f32 1.0, %v2613_v2 }
 0x975   :  { %v2617_v32 = vpop.eup %2616  ;;  %v1182_v33 = vadd.f32 1.0, %v2615_v14 }
 0x976   :  { %v1183_v18 = vadd.f32 1.0, %v2617_v32  ;;  %2618 = vrcp.f32 %v1181_v5 }
 0x977   :  { %2620 = vrcp.f32 %v1182_v33 }
 0x978   :  { %2622 = vrcp.f32 %v1183_v18 }
 0x980   :  { %v2619_v42 = vpop.eup %2618 }
 0x981   :  { %v2621_v44 = vpop.eup %2620  ;;  %v1190_v34 = vmul.f32 %v2619_v42, %v1169_v28 }
 0x982   :  { %v2623_v37 = vpop.eup %2622  ;;  %v1191_v10 = vmul.f32 %v2621_v44, %v1170_v29 }
 0x983   :  { %v1192_v38 = vmul.f32 %v2623_v37, %v1171_v30  ;;  %1193 = vst [vmem:[%s3066_s6] sm:$0xff] %v1190_v34 }
 0x984   :  { %1194 = vst [vmem:[%s3066_s6 + $0x8] sm:$0xff] %v1191_v10 }
 0x985   :  { %1195 = vst [vmem:[%s3066_s6 + $0x10] sm:$0xff] %v1192_v38 }
 0x9d0   :  { %v2309_v39 = vpop.permute.xlu0 %2308 }
 0x9d1   :  { %v2311_v40 = vadd.f32 %v2309_v39, %v2303_v22  ;;  %v2312_v41 = vadd.f32 %v2309_v39, %v2304_v23  ;;  %v2313_v43 = vadd.f32 %v2309_v39, %v2305_v24 }
 0x9d3   :  { %v2424_v45 = vmul.f32 -1.442695, %v2311_v40  ;;  %v2425_v27 = vmul.f32 -1.442695, %v2312_v41  ;;  %v2426_v20 = vmul.f32 -1.442695, %v2313_v43 }
 0x9d5   :  { %2624 = vpow2.f32 %v2424_v45 }
 0x9d6   :  { %2626 = vpow2.f32 %v2425_v27 }
 0x9d7   :  { %2628 = vpow2.f32 %v2426_v20 }
 0x9df   :  { %v2625_v46 = vpop.eup %2624 }
 0x9e0   :  { %v2627_v35 = vpop.eup %2626  ;;  %v2323_v1 = vadd.f32 1.0, %v2625_v46 }
 0x9e1   :  { %v2629_v47 = vpop.eup %2628  ;;  %v2324_v48 = vadd.f32 1.0, %v2627_v35 }
 0x9e2   :  { %v2325_v56 = vadd.f32 1.0, %v2629_v47  ;;  %2630 = vrcp.f32 %v2323_v1 }
 0x9e3   :  { %2632 = vrcp.f32 %v2324_v48 }
 0x9e4   :  { %2634 = vrcp.f32 %v2325_v56 }
 0x9ec   :  { %v2631_v59 = vpop.eup %2630 }
 0x9ed   :  { %v2633_v49 = vpop.eup %2632  ;;  %v2332_v61 = vmul.f32 %v2631_v59, %v2311_v40 }
 0x9ee   :  { %v2635_v50 = vpop.eup %2634  ;;  %v2333_v51 = vmul.f32 %v2633_v49, %v2312_v41 }
 0x9ef   :  { %v2334_v52 = vmul.f32 %v2635_v50, %v2313_v43  ;;  %2427 = vst [vmem:[%s3066_s6 + $0x18] sm:$0xff] %v2332_v61 }
 0x9f0   :  { %2428 = vst [vmem:[%s3066_s6 + $0x20] sm:$0xff] %v2333_v51 }
 0x9f1   :  { %2429 = vst [vmem:[%s3066_s6 + $0x28] sm:$0xff] %v2334_v52 }

</bundles_post_ra>
